<compile_context>
chip_gen: v7x
topology: tpu7x:2x2x1
jax: 0.10.0
libtpu: 0.0.40
codegen_flags: <defaults>
</compile_context>

<pallas_src>
import functools

import jax
import jax.numpy as jnp
from jax import lax
from jax.experimental import pallas as pl
from jax.experimental.pallas import tpu as pltpu


def _round_up(x, m):
    return ((x + m - 1) // m) * m


def _vq_kernel(z_ref, wpre_ref, bpre_ref, cnt_ref, hcsq_ref, cpost_ref,
               bpost_ref, zq_ref, idx_ref, losspart_ref, *,
               n_valid, matmul_dtype):
    eps = 1e-12
    md = matmul_dtype
    tile_n = z_ref.shape[0]
    n_e = cnt_ref.shape[1]

    # latent_proj_pre: z @ W_pre^T + b_pre (operands pre-transposed and, on the
    # bf16 path, pre-cast in the wrapper; f32 accumulation + f32 bias).
    z_reduce = jnp.dot(z_ref[...], wpre_ref[...],
                       preferred_element_type=jnp.float32) + bpre_ref[...]

    # F.normalize(z_reduce, dim=-1) with eps clamp on the norm.
    zn_sq = jnp.sum(z_reduce * z_reduce, axis=1, keepdims=True)      # (tn, 1)
    norm_c = jnp.maximum(jnp.sqrt(zn_sq), eps)
    zf = z_reduce / norm_c                                           # (tn, r)

    # d = |zf|^2 + |cn|^2 - 2 * zf @ cn^T.  |zf|^2 is row-constant (argmin
    # invariant); fold |cn|^2 in with one broadcast subtract:
    #   argmin(d) == argmax(s - 0.5*|cn|^2).
    s = jnp.dot(zf.astype(md), cnt_ref[...],
                preferred_element_type=jnp.float32)                  # (tn, n_e)
    shifted = s - hcsq_ref[...]
    m = jnp.max(shifted, axis=1, keepdims=True)                      # (tn, 1)

    # first-index argmin over codes; column iota kept (1, n_e), broadcast.
    col = lax.broadcasted_iota(jnp.int32, (1, n_e), 1)
    idx_col = jnp.min(jnp.where(shifted == m, col, n_e),
                      axis=1, keepdims=True)                         # (tn,1) i32
    idx_ref[...] = idx_col                                           # plain block

    onehot = (col == idx_col).astype(md)                             # (tn, n_e)

    # commitment loss, algebraically (no z_q_reduce / diff intermediates):
    #   |cn_g - z_reduce|^2 = |cn_g|^2 - 2*|z_reduce|*s_g + |z_reduce|^2,
    # with s_g = zf . cn_g = m + 0.5*|cn_g|^2 and z_reduce = zf * norm_c.
    hcsq_g = jnp.sum(onehot * hcsq_ref[...], axis=1, keepdims=True)  # 0.5|cn_g|^2
    s_g = m + hcsq_g
    per_row = 2.0 * hcsq_g - 2.0 * norm_c * s_g + zn_sq              # (tn, 1)
    row = lax.broadcasted_iota(jnp.int32, (tile_n, 1), 0)
    valid = (pl.program_id(0) * tile_n + row) < n_valid              # mask pad rows
    partial = jnp.sum(jnp.where(valid, per_row, 0.0))
    losspart_ref[...] = jnp.broadcast_to(partial, losspart_ref.shape)

    # straight-through estimator is identity in the forward pass; codebook
    # lookup + latent_proj_post fused into a single K=n_e matmul:
    #   z_q = onehot @ (cn @ W_post^T) + b_post.
    zq_ref[...] = (jnp.dot(onehot, cpost_ref[...],
                           preferred_element_type=jnp.float32)
                   + bpost_ref[...]).astype(zq_ref.dtype)


def vector_quantize_reduce_simple(z, code, w_pre, b_pre, w_post, b_post,
                                  beta=0.25, legacy=True, tile_n=2048,
                                  matmul_dtype=jnp.float32):
    """z: (..., e_dim). Returns (z_q, loss, (None, None, indices)).

    matmul_dtype=jnp.bfloat16 is the recommended fast path on v6e/v7x (MXU
    operands only; f32 accumulation / argmin / loss math); default f32
    preserves the module's exact forward semantics.
    """
    del legacy  # legacy / non-legacy have identical forward loss values
    eps = 1e-12
    e_dim = z.shape[-1]
    n_e, e_dim_reduce = code.shape
    lead = z.shape[:-1]
    md = jnp.dtype(matmul_dtype)
    f32 = jnp.float32

    z_flat = z.reshape(-1, e_dim)
    if z_flat.dtype != md:
        z_flat = z_flat.astype(md)          # bf16 path: halve the z HBM stream
    n = z_flat.shape[0]

    # Row tiling: multiple of 8 sublanes, padding kept < 8*num_tiles rows, and
    # >= 2 grid steps whenever possible (v7x megacore; neutral on v5e/v6e).
    num_tiles = max(1, pl.cdiv(n, int(tile_n)))
    if n > 8 and num_tiles < 2:
        num_tiles = 2
    tn = _round_up(pl.cdiv(n, num_tiles), 8)
    num_tiles = pl.cdiv(n, tn)
    n_pad = num_tiles * tn
    if n_pad != n:                          # only copy when actually ragged
        z_flat = jnp.pad(z_flat, ((0, n_pad - n), (0, 0)))

    # Hoisted (grid-invariant) parameter prep: normalized codebook transpose,
    # folded 0.5*|cn|^2, pre-transposed W_pre, fused cn @ W_post^T.
    code_f = code.astype(f32)
    cn = code_f / jnp.maximum(
        jnp.sqrt(jnp.sum(code_f * code_f, axis=1, keepdims=True)), eps)
    half_csq = 0.5 * jnp.sum(cn * cn, axis=1)[None, :]               # (1, n_e)
    cnt = cn.T.astype(md)                                            # (r, n_e)
    wpre_t = w_pre.T.astype(md)                                      # (e_dim, r)
    bpre = b_pre.reshape(1, -1).astype(f32)                          # (1, r)
    code_post = jnp.dot(cn, w_post.T.astype(f32),
                        precision=jax.lax.Precision.HIGHEST).astype(md)  # (n_e, e_dim)
    bpost = b_post.reshape(1, -1).astype(f32)                        # (1, e_dim)

    def const(shape):  # VMEM-resident parameter block (same block every step)
        return pl.BlockSpec(shape, lambda i, _n=len(shape): (0,) * _n)

    out_shapes = (
        jax.ShapeDtypeStruct((n_pad, e_dim), f32),        # z_q (padded rows)
        jax.ShapeDtypeStruct((n_pad, 1), jnp.int32),      # indices
        jax.ShapeDtypeStruct((num_tiles, 1, 128), f32),   # per-tile loss partials
    )

    kernel = functools.partial(_vq_kernel, n_valid=n, matmul_dtype=md)
    zq_pad, idx_out, loss_parts = pl.pallas_call(
        kernel,
        grid=(num_tiles,),
        out_shape=out_shapes,
        in_specs=[
            pl.BlockSpec((tn, e_dim), lambda i: (i, 0)),  # z rows (tiled)
            const((e_dim, e_dim_reduce)),                 # W_pre^T
            const((1, e_dim_reduce)),                     # b_pre
            const((e_dim_reduce, n_e)),                   # cn^T
            const((1, n_e)),                              # 0.5*|cn|^2
            const((n_e, e_dim)),                          # cn @ W_post^T
            const((1, e_dim)),                            # b_post
        ],
        out_specs=(
            pl.BlockSpec((tn, e_dim), lambda i: (i, 0)),
            pl.BlockSpec((tn, 1), lambda i: (i, 0)),
            pl.BlockSpec((1, 1, 128), lambda i: (i, 0, 0)),
        ),
        compiler_params=pltpu.CompilerParams(
            dimension_semantics=("parallel",),
            vmem_limit_bytes=48 * 1024 * 1024),
    )(z_flat, wpre_t, bpre, cnt, half_csq, code_post, bpost)

    zq_flat = zq_pad if n_pad == n else zq_pad[:n]
    z_q = zq_flat.reshape(*lead, e_dim)
    idx_flat = idx_out.reshape(-1)
    idx = idx_flat if n_pad == n else idx_flat[:n]
    mse = loss_parts[:, 0, 0].sum() / (n * e_dim_reduce)
    loss = (1.0 + beta) * mse        # forward value of both legacy variants
    return z_q, loss, (None, None, idx)


def _reference(z2d, code, w_pre, b_pre, w_post, b_post, beta):
    """Pure-JAX reference mirroring the PyTorch forward."""
    eps = 1e-12
    z_reduce = z2d @ w_pre.T + b_pre
    zf = z_reduce / jnp.maximum(
        jnp.linalg.norm(z_reduce, axis=1, keepdims=True), eps)
    cn = code / jnp.maximum(jnp.linalg.norm(code, axis=1, keepdims=True), eps)
    d = (jnp.sum(zf ** 2, axis=1, keepdims=True) + jnp.sum(cn ** 2, axis=1)
         - 2.0 * zf @ cn.T)
    idx = jnp.argmin(d, axis=1)
    z_q_reduce = cn[idx]
    mse = jnp.mean((z_q_reduce - z_reduce) ** 2)
    loss = mse + beta * mse
    z_q = z_q_reduce @ w_post.T + b_post
    return z_q, loss, idx


if __name__ == "__main__":
    e_dim, e_dim_reduce, n_e = 64, 32, 128
    beta = 0.25

    key = jax.random.PRNGKey(0)
    k_z, k_z2, k_z3, k_code, k_wpre, k_bpre, k_wpost, k_bpost = \
        jax.random.split(key, 8)

    code = jax.random.uniform(k_code, (n_e, e_dim_reduce),
                              minval=-1.0 / n_e, maxval=1.0 / n_e,
                              dtype=jnp.float32)
    w_pre = jax.random.normal(k_wpre, (e_dim_reduce, e_dim), jnp.float32) * 0.05
    b_pre = jax.random.normal(k_bpre, (e_dim_reduce,), jnp.float32) * 0.05
    w_post = jax.random.normal(k_wpost, (e_dim, e_dim_reduce), jnp.float32) * 0.05
    b_post = jax.random.normal(k_bpost, (e_dim,), jnp.float32) * 0.05

    def check(z_in, tile_rows):
        z_q, loss, (_, _, idx) = vector_quantize_reduce_simple(
            z_in, code, w_pre, b_pre, w_post, b_post,
            beta=beta, legacy=True, tile_n=tile_rows)
        jax.block_until_ready((z_q, loss, idx))
        zq_r, loss_r, idx_r = _reference(
            z_in.reshape(-1, e_dim), code, w_pre, b_pre, w_post, b_post, beta)
        assert z_q.shape == z_in.shape
        assert jnp.allclose(z_q.reshape(-1, e_dim), zq_r, atol=1e-5, rtol=1e-5)
        assert jnp.allclose(loss, loss_r, atol=1e-5, rtol=1e-5)
        assert jnp.array_equal(idx.astype(jnp.int32), idx_r.astype(jnp.int32))

    # single-tile path (N=8 rows -> one grid step)
    z3 = jax.random.normal(k_z3, (1, 8, e_dim), dtype=jnp.float32)
    check(z3, tile_rows=2048)
    # multi-tile path: N=16 rows split across 2 tiles (default tile selection)
    z1 = jax.random.normal(k_z, (2, 8, e_dim), dtype=jnp.float32)
    check(z1, tile_rows=2048)
    check(z1, tile_rows=8)
    # ragged row count: 15 rows -> 1 padded row, exercises loss masking
    z2 = jax.random.normal(k_z2, (3, 5, e_dim), dtype=jnp.float32)
    check(z2, tile_rows=8)

    # bf16 matmul-operand path (v6e/v7x fast path): smoke run only — argmin
    # can legitimately flip on near-ties vs the f32 reference.
    z_q_bf, loss_bf, (_, _, idx_bf) = vector_quantize_reduce_simple(
        z1, code, w_pre, b_pre, w_post, b_post, beta=beta,
        tile_n=8, matmul_dtype=jnp.bfloat16)
    jax.block_until_ready((z_q_bf, loss_bf, idx_bf))
    assert bool(jnp.all(jnp.isfinite(z_q_bf))) and bool(jnp.isfinite(loss_bf))

    print("KERNEL_OK")
</pallas_src>

<mosaic_0001>
module attributes {stable_mosaic.version = 11 : i64} {
  func.func @_vq_kernel(%arg0: i32, %arg1: memref<8x64xf32, #tpu.memory_space<vmem>>, %arg2: memref<64x32xf32, #tpu.memory_space<vmem>>, %arg3: memref<1x32xf32, #tpu.memory_space<vmem>>, %arg4: memref<32x128xf32, #tpu.memory_space<vmem>>, %arg5: memref<1x128xf32, #tpu.memory_space<vmem>>, %arg6: memref<128x64xf32, #tpu.memory_space<vmem>>, %arg7: memref<1x64xf32, #tpu.memory_space<vmem>>, %arg8: memref<8x64xf32, #tpu.memory_space<vmem>>, %arg9: memref<8x1xi32, #tpu.memory_space<vmem>>, %arg10: memref<1x1x128xf32, #tpu.memory_space<vmem>>) attributes {dimension_semantics = [#tpu.dimension_semantics<parallel>], iteration_bounds = array<i64: 1>, scalar_prefetch = 0 : i64, scratch_operands = 0 : i64, tpu.core_type = #tpu.core_type<tc>, window_params = [{transform_indices = @transform_0, window_bounds = array<i64: 8, 64>}, {pipeline_mode = #tpu.pipeline_mode<synchronous>, transform_indices = @transform_1, window_bounds = array<i64: 64, 32>}, {pipeline_mode = #tpu.pipeline_mode<synchronous>, transform_indices = @transform_2, window_bounds = array<i64: 1, 32>}, {pipeline_mode = #tpu.pipeline_mode<synchronous>, transform_indices = @transform_3, window_bounds = array<i64: 32, 128>}, {pipeline_mode = #tpu.pipeline_mode<synchronous>, transform_indices = @transform_4, window_bounds = array<i64: 1, 128>}, {pipeline_mode = #tpu.pipeline_mode<synchronous>, transform_indices = @transform_5, window_bounds = array<i64: 128, 64>}, {pipeline_mode = #tpu.pipeline_mode<synchronous>, transform_indices = @transform_6, window_bounds = array<i64: 1, 64>}, {transform_indices = @transform_7, window_bounds = array<i64: 8, 64>}, {transform_indices = @transform_8, window_bounds = array<i64: 8, 1>}, {transform_indices = @transform_9, window_bounds = array<i64: 1, 1, 128>}]} {
    %c0 = arith.constant 0 : index
    %c0_0 = arith.constant 0 : index
    %0 = vector.load %arg1[%c0, %c0_0] : memref<8x64xf32, #tpu.memory_space<vmem>>, vector<8x64xf32>
    %c0_1 = arith.constant 0 : index
    %c0_2 = arith.constant 0 : index
    %1 = vector.load %arg2[%c0_1, %c0_2] : memref<64x32xf32, #tpu.memory_space<vmem>>, vector<64x32xf32>
    %cst = arith.constant dense<0.000000e+00> : vector<8x32xf32>
    %2 = tpu.matmul %0, %1, %cst {dimension_numbers = #tpu.dot_dimension_numbers<[1], [0], [0], [1], [0, 0, 1, 1], [], []>} : vector<8x64xf32>, vector<64x32xf32>, vector<8x32xf32> -> vector<8x32xf32>
    %c0_3 = arith.constant 0 : index
    %c0_4 = arith.constant 0 : index
    %3 = vector.load %arg3[%c0_3, %c0_4] : memref<1x32xf32, #tpu.memory_space<vmem>>, vector<1x32xf32>
    %4 = vector.broadcast %3 : vector<1x32xf32> to vector<8x32xf32>
    %5 = arith.addf %2, %4 : vector<8x32xf32>
    %6 = arith.mulf %5, %5 : vector<8x32xf32>
    %cst_5 = arith.constant dense<0.000000e+00> : vector<8xf32>
    %7 = vector.multi_reduction <add>, %6, %cst_5 [1] : vector<8x32xf32> to vector<8xf32>
    %8 = vector.shape_cast %7 : vector<8xf32> to vector<8x1xf32>
    %9 = math.sqrt %8 : vector<8x1xf32>
    %cst_6 = arith.constant 9.99999996E-13 : f32
    %10 = vector.broadcast %cst_6 : f32 to vector<8x1xf32>
    %11 = arith.maximumf %9, %10 : vector<8x1xf32>
    %12 = vector.broadcast %11 : vector<8x1xf32> to vector<8x32xf32>
    %13 = arith.divf %5, %12 : vector<8x32xf32>
    %c0_7 = arith.constant 0 : index
    %c0_8 = arith.constant 0 : index
    %14 = vector.load %arg4[%c0_7, %c0_8] : memref<32x128xf32, #tpu.memory_space<vmem>>, vector<32x128xf32>
    %cst_9 = arith.constant dense<0.000000e+00> : vector<8x128xf32>
    %15 = tpu.matmul %13, %14, %cst_9 {dimension_numbers = #tpu.dot_dimension_numbers<[1], [0], [0], [1], [0, 0, 1, 1], [], []>} : vector<8x32xf32>, vector<32x128xf32>, vector<8x128xf32> -> vector<8x128xf32>
    %c0_10 = arith.constant 0 : index
    %c0_11 = arith.constant 0 : index
    %16 = vector.load %arg5[%c0_10, %c0_11] : memref<1x128xf32, #tpu.memory_space<vmem>>, vector<1x128xf32>
    %17 = vector.broadcast %16 : vector<1x128xf32> to vector<8x128xf32>
    %18 = arith.subf %15, %17 : vector<8x128xf32>
    %cst_12 = arith.constant dense<0xFF800000> : vector<8xf32>
    %19 = vector.multi_reduction <maximumf>, %18, %cst_12 [1] : vector<8x128xf32> to vector<8xf32>
    %20 = vector.shape_cast %19 : vector<8xf32> to vector<8x1xf32>
    %21 = tpu.iota {dimensions = array<i32: 1>} : vector<1x128xi32>
    %22 = vector.broadcast %20 : vector<8x1xf32> to vector<8x128xf32>
    %23 = arith.cmpf oeq, %18, %22 : vector<8x128xf32>
    %c128_i32 = arith.constant 128 : i32
    %24 = vector.shape_cast %21 : vector<1x128xi32> to vector<1x128xi32>
    %25 = vector.broadcast %24 : vector<1x128xi32> to vector<8x128xi32>
    %26 = vector.broadcast %c128_i32 : i32 to vector<8x128xi32>
    %27 = arith.select %23, %25, %26 : vector<8x128xi1>, vector<8x128xi32>
    %cst_13 = arith.constant dense<2147483647> : vector<8xi32>
    %28 = vector.multi_reduction <minsi>, %27, %cst_13 [1] : vector<8x128xi32> to vector<8xi32>
    %29 = vector.shape_cast %28 : vector<8xi32> to vector<8x1xi32>
    %c0_14 = arith.constant 0 : index
    %c0_15 = arith.constant 0 : index
    %30 = vector.load %arg9[%c0_14, %c0_15] : memref<8x1xi32, #tpu.memory_space<vmem>>, vector<8x1xi32>
    tpu.vector_store %arg9[%c0_14, %c0_15], %29 {strides = array<i32>} : memref<8x1xi32, #tpu.memory_space<vmem>>, vector<8x1xi32>,
    %31 = vector.broadcast %21 : vector<1x128xi32> to vector<8x128xi32>
    %32 = vector.broadcast %29 : vector<8x1xi32> to vector<8x128xi32>
    %33 = arith.cmpi eq, %31, %32 : vector<8x128xi32>
    %34 = arith.extui %33 : vector<8x128xi1> to vector<8x128xi32>
    %35 = arith.sitofp %34 : vector<8x128xi32> to vector<8x128xf32>
    %c0_16 = arith.constant 0 : index
    %c0_17 = arith.constant 0 : index
    %36 = vector.load %arg5[%c0_16, %c0_17] : memref<1x128xf32, #tpu.memory_space<vmem>>, vector<1x128xf32>
    %37 = vector.broadcast %36 : vector<1x128xf32> to vector<8x128xf32>
    %38 = arith.mulf %35, %37 : vector<8x128xf32>
    %cst_18 = arith.constant dense<0.000000e+00> : vector<8xf32>
    %39 = vector.multi_reduction <add>, %38, %cst_18 [1] : vector<8x128xf32> to vector<8xf32>
    %40 = vector.shape_cast %39 : vector<8xf32> to vector<8x1xf32>
    %41 = arith.addf %20, %40 : vector<8x1xf32>
    %cst_19 = arith.constant 2.000000e+00 : f32
    %42 = vector.broadcast %cst_19 : f32 to vector<8x1xf32>
    %43 = arith.mulf %42, %40 : vector<8x1xf32>
    %cst_20 = arith.constant 2.000000e+00 : f32
    %44 = vector.broadcast %cst_20 : f32 to vector<8x1xf32>
    %45 = arith.mulf %44, %11 : vector<8x1xf32>
    %46 = arith.mulf %45, %41 : vector<8x1xf32>
    %47 = arith.subf %43, %46 : vector<8x1xf32>
    %48 = arith.addf %47, %8 : vector<8x1xf32>
    %49 = tpu.iota {dimensions = array<i32: 0>} : vector<8x1xi32>
    %c8_i32 = arith.constant 8 : i32
    %50 = arith.muli %arg0, %c8_i32 : i32
    %51 = vector.broadcast %50 : i32 to vector<8x1xi32>
    %52 = arith.addi %51, %49 : vector<8x1xi32>
    %c8_i32_21 = arith.constant 8 : i32
    %53 = vector.broadcast %c8_i32_21 : i32 to vector<8x1xi32>
    %54 = arith.cmpi slt, %52, %53 : vector<8x1xi32>
    %cst_22 = arith.constant 0.000000e+00 : f32
    %55 = vector.broadcast %cst_22 : f32 to vector<8x1xf32>
    %56 = arith.select %54, %48, %55 : vector<8x1xi1>, vector<8x1xf32>
    %57 = vector.shape_cast %56 : vector<8x1xf32> to vector<1x8x1xf32>
    %cst_23 = arith.constant dense<0.000000e+00> : vector<1xf32>
    %58 = vector.multi_reduction <add>, %57, %cst_23 [1, 2] : vector<1x8x1xf32> to vector<1xf32>
    %59 = vector.shape_cast %58 : vector<1xf32> to vector<1x1x1xf32>
    %60 = vector.extract %59[0, 0, 0] : f32 from vector<1x1x1xf32>
    %61 = vector.broadcast %60 : f32 to vector<1x1x128xf32>
    %c0_24 = arith.constant 0 : index
    %c0_25 = arith.constant 0 : index
    %c0_26 = arith.constant 0 : index
    %62 = vector.load %arg10[%c0_24, %c0_25, %c0_26] : memref<1x1x128xf32, #tpu.memory_space<vmem>>, vector<1x1x128xf32>
    tpu.vector_store %arg10[%c0_24, %c0_25, %c0_26], %61 {strides = array<i32>} : memref<1x1x128xf32, #tpu.memory_space<vmem>>, vector<1x1x128xf32>,
    %c0_27 = arith.constant 0 : index
    %c0_28 = arith.constant 0 : index
    %63 = vector.load %arg6[%c0_27, %c0_28] : memref<128x64xf32, #tpu.memory_space<vmem>>, vector<128x64xf32>
    %cst_29 = arith.constant dense<0.000000e+00> : vector<8x64xf32>
    %64 = tpu.matmul %35, %63, %cst_29 {dimension_numbers = #tpu.dot_dimension_numbers<[1], [0], [0], [1], [0, 0, 1, 1], [], []>} : vector<8x128xf32>, vector<128x64xf32>, vector<8x64xf32> -> vector<8x64xf32>
    %c0_30 = arith.constant 0 : index
    %c0_31 = arith.constant 0 : index
    %65 = vector.load %arg7[%c0_30, %c0_31] : memref<1x64xf32, #tpu.memory_space<vmem>>, vector<1x64xf32>
    %66 = vector.broadcast %65 : vector<1x64xf32> to vector<8x64xf32>
    %67 = arith.addf %64, %66 : vector<8x64xf32>
    %c0_32 = arith.constant 0 : index
    %c0_33 = arith.constant 0 : index
    %68 = vector.load %arg8[%c0_32, %c0_33] : memref<8x64xf32, #tpu.memory_space<vmem>>, vector<8x64xf32>
    tpu.vector_store %arg8[%c0_32, %c0_33], %67 {strides = array<i32>} : memref<8x64xf32, #tpu.memory_space<vmem>>, vector<8x64xf32>,
    return
  }
  func.func @transform_0(%arg0: i32) -> (i32, i32) {
    %c0_i32 = arith.constant 0 : i32
    %c0_i32_0 = arith.constant 0 : i32
    return %arg0, %c0_i32 : i32, i32
  }
  func.func @transform_1(%arg0: i32) -> (i32, i32) {
    %c0_i32 = arith.constant 0 : i32
    %c0_i32_0 = arith.constant 0 : i32
    %c0_i32_1 = arith.constant 0 : i32
    return %c0_i32, %c0_i32_0 : i32, i32
  }
  func.func @transform_2(%arg0: i32) -> (i32, i32) {
    %c0_i32 = arith.constant 0 : i32
    %c0_i32_0 = arith.constant 0 : i32
    %c0_i32_1 = arith.constant 0 : i32
    return %c0_i32, %c0_i32_0 : i32, i32
  }
  func.func @transform_3(%arg0: i32) -> (i32, i32) {
    %c0_i32 = arith.constant 0 : i32
    %c0_i32_0 = arith.constant 0 : i32
    %c0_i32_1 = arith.constant 0 : i32
    return %c0_i32, %c0_i32_0 : i32, i32
  }
  func.func @transform_4(%arg0: i32) -> (i32, i32) {
    %c0_i32 = arith.constant 0 : i32
    %c0_i32_0 = arith.constant 0 : i32
    %c0_i32_1 = arith.constant 0 : i32
    return %c0_i32, %c0_i32_0 : i32, i32
  }
  func.func @transform_5(%arg0: i32) -> (i32, i32) {
    %c0_i32 = arith.constant 0 : i32
    %c0_i32_0 = arith.constant 0 : i32
    %c0_i32_1 = arith.constant 0 : i32
    return %c0_i32, %c0_i32_0 : i32, i32
  }
  func.func @transform_6(%arg0: i32) -> (i32, i32) {
    %c0_i32 = arith.constant 0 : i32
    %c0_i32_0 = arith.constant 0 : i32
    %c0_i32_1 = arith.constant 0 : i32
    return %c0_i32, %c0_i32_0 : i32, i32
  }
  func.func @transform_7(%arg0: i32) -> (i32, i32) {
    %c0_i32 = arith.constant 0 : i32
    %c0_i32_0 = arith.constant 0 : i32
    return %arg0, %c0_i32 : i32, i32
  }
  func.func @transform_8(%arg0: i32) -> (i32, i32) {
    %c0_i32 = arith.constant 0 : i32
    %c0_i32_0 = arith.constant 0 : i32
    return %arg0, %c0_i32 : i32, i32
  }
  func.func @transform_9(%arg0: i32) -> (i32, i32, i32) {
    %c0_i32 = arith.constant 0 : i32
    %c0_i32_0 = arith.constant 0 : i32
    %c0_i32_1 = arith.constant 0 : i32
    return %arg0, %c0_i32, %c0_i32_0 : i32, i32, i32
  }
}

</mosaic_0001>

<bundles_post_ra>
// kernel: tpu_custom_call.1
= control target key start
LH: loop header
LB: loop body
LE: loop exit
PB: predicated region body
PF: predicated region fallthrough
CT: control target
= control target key end

     0   :  { %15 = vsyncpa [#allocation3], 0  ;;  %v613_v3 = vmov 0.0|0.0   ;;  %vm614_vm0 = vmmov 0   ;;  %v615_v6 = vmov 0.0   ;;  %s847_s0 = inlined_call_operand.vmem [shape: f32[8,64], index: 0, kind: input, shape index: {}]   ;;  %s848_s1 = inlined_call_operand.vmem [shape: f32[64,32], index: 1, kind: input, shape index: {}]   ;;  %s849_s2 = inlined_call_operand.vmem [shape: f32[1,32], index: 2, kind: input, shape index: {}]   ;;  %s850_s3 = inlined_call_operand.vmem [shape: f32[32,128], index: 3, kind: input, shape index: {}]   ;;  %s851_s4 = inlined_call_operand.vmem [shape: f32[1,128], index: 4, kind: input, shape index: {}]   ;;  %s852_s5 = inlined_call_operand.vmem [shape: f32[128,64], index: 5, kind: input, shape index: {}]   ;;  %s853_s6 = inlined_call_operand.vmem [shape: f32[1,64], index: 6, kind: input, shape index: {}]   ;;  %s854_s7 = inlined_call_operand.hbm [shape: f32[8,64], index: 7, kind: output, shape index: {0}]   ;;  %s855_s8 = inlined_call_operand.vmem [shape: s32[8,1], index: 8, kind: output, shape index: {1}]   ;;  %s856_s9 = inlined_call_operand.hbm [shape: f32[1,1,128], index: 9, kind: output, shape index: {2}]  }
   0x1   :  { %v32_v0 = vld [vmem:[%s848_s1] sm:$0xff]  ;;  %v33_v1 = vld [vmem:[%s848_s1 + $0x8] sm:$0xff]  ;;  %v34_v2 = vld [vmem:[%s848_s1 + $0x10] sm:$0xff]  ;;  %511 = vmatprep.subr.bf16.mxu0 %v613_v3  ;;  %462 = vmatprep.mubr.msk.f32.mxu0 %vm614_vm0, %v615_v6 }
   0x2   :  { %v512_v4 = vpack.c.bf16 %v33_v1, %v32_v0  ;;  %v35_v5 = vld [vmem:[%s848_s1 + $0x18] sm:$0xff]  ;;  %529 = vmatprep.subr.bf16.mxu1 %v613_v3  ;;  %508 = vmatprep.mubr.msk.f32.mxu1 %vm614_vm0, %v615_v6 }
   0x3   :  { %v515_v7 = vpack.c.bf16 %v35_v5, %v34_v2 }
   0x4   :  { %513 = vmatpush3.bf16.msra.mxu0 %v512_v4 }
   0x5   :  { %16 = vsyncpa [#allocation5], 0  ;;  %514 = vmatprep.subr.bf16.mxu0 %v613_v3  ;;  %v36_v8 = vld [vmem:[%s848_s1 + $0x20] sm:$0xff]  ;;  %v37_v9 = vld [vmem:[%s848_s1 + $0x28] sm:$0xff]  ;;  %vm47_vm1 = vcmask 523264   ;;  %vm122_vm2 = vcmask 261120   ;;  %v223_v40 = vlaneseq }
   0x6   :  { %v518_v10 = vpack.c.bf16 %v37_v9, %v36_v8  ;;  %v38_v11 = vld [vmem:[%s848_s1 + $0x30] sm:$0xff]  ;;  %v39_v12 = vld [vmem:[%s848_s1 + $0x38] sm:$0xff]  ;;  %v31_v14 = vld [vmem:[%s847_s0] sm:$0xff]  ;;  %vm241_vm7 = vcmask 7168   ;;  %s617_s21 = smov [#allocation2]  }
   0x7   :  { %v521_v13 = vpack.c.bf16 %v39_v12, %v38_v11  ;;  %v407_v15 = vld [vmem:[%s849_s2] ss:$0 sm:$0xff]  ;;  %v137_v22 = vld [vmem:[%s850_s3 + $0x8] sm:$0xff]  ;;  %v138_v23 = vld [vmem:[%s850_s3 + $0x10] sm:$0xff]  ;;  %v746_v41 = vand.u32 127, %v223_v40  ;;  %s381_s22 = sshll.u32 %s617_s21, 4  ;;  %s382_s22 = int_to_ptr.vmem [resolvable:$true] %s381_s22 }
   0x8   :  { %516 = vmatpush3.bf16.msra.mxu0 %v515_v7  ;;  %v136_v21 = vld [vmem:[%s850_s3] sm:$0xff]  ;;  %v139_v25 = vld [vmem:[%s850_s3 + $0x18] sm:$0xff]  ;;  %v282_v47 = vld [vmem:[%s852_s5 + $0x8] sm:$0xff]  ;;  %s565_s23 = scalar_lea.vmem %s382_s22, 128  ;;  %p570_p1 = scmp.lt.s32.totalorder %s382_s22, %s382_s22 }
   0x9   :  { %517 = vmatprep.subr.bf16.mxu0 %v613_v3  ;;  %v524_v24 = vpack.c.bf16 %v137_v22, %v136_v21  ;;  %v527_v26 = vpack.c.bf16 %v139_v25, %v138_v23  ;;  %v743_v36 = vld [vmem:[%s851_s4] ss:$0 sm:$0xff]  ;;  %v283_v48 = vld [vmem:[%s852_s5 + $0x10] sm:$0xff]  ;;  %v284_v50 = vld [vmem:[%s852_s5 + $0x18] sm:$0xff]  ;;  %p566_p0 = scmp.ne.s32.totalorder %s382_s22, %s565_s23  ;;  %p571_p2 = scmp.lt.s32.totalorder %s565_s23, %s565_s23 }
   0xa   :  { %v281_v46 = vld [vmem:[%s852_s5] sm:$0xff]  ;;  %v533_v51 = vpack.c.bf16 %v284_v50, %v283_v48  ;;  %v286_v53 = vld [vmem:[%s852_s5 + $0x28] sm:$0xff]  ;;  %v287_v55 = vld [vmem:[%s852_s5 + $0x30] sm:$0xff] }
   0xb   :  { %v530_v49 = vpack.c.bf16 %v282_v47, %v281_v46  ;;  %v285_v52 = vld [vmem:[%s852_s5 + $0x20] sm:$0xff]  ;;  %v288_v56 = vld [vmem:[%s852_s5 + $0x38] sm:$0xff]  ;;  %v290_v59 = vld [vmem:[%s852_s5 + $0x48] sm:$0xff]  ;;  %p572_p3 = por %p571_p2, %p570_p1 }
   0xc   :  { %519 = vmatpush3.bf16.msra.mxu0 %v518_v10  ;;  %v536_v54 = vpack.c.bf16 %v286_v53, %v285_v52  ;;  %v539_v57 = vpack.c.bf16 %v288_v56, %v287_v55  ;;  %v289_v58 = vld [vmem:[%s852_s5 + $0x40] sm:$0xff]  ;;  %v291_v61 = vld [vmem:[%s852_s5 + $0x50] sm:$0xff]  ;;  %v292_v62 = vld [vmem:[%s852_s5 + $0x58] sm:$0xff] }
   0xd   :  { %520 = vmatprep.subr.bf16.mxu0 %v613_v3  ;;  %531 = vmatpush3.bf16.msra.mxu1 %v530_v49  ;;  %v542_v60 = vpack.c.bf16 %v290_v59, %v289_v58  ;;  %v545_v63 = vpack.c.bf16 %v292_v62, %v291_v61  ;;  %v293_v0 = vld [vmem:[%s852_s5 + $0x60] sm:$0xff]  ;;  %v294_v1 = vld [vmem:[%s852_s5 + $0x68] sm:$0xff]  ;;  %v295_v9 = vld [vmem:[%s852_s5 + $0x70] sm:$0xff]  ;;  %p573_p4 = pnand %p572_p3, %p566_p0 }
   0xe   :  { %532 = vmatprep.subr.bf16.mxu1 %v613_v3  ;;  %v548_v2 = vpack.c.bf16 %v294_v1, %v293_v0  ;;  %v296_v10 = vld [vmem:[%s852_s5 + $0x78] sm:$0xff] }
   0xf   :  { %v551_v11 = vpack.c.bf16 %v296_v10, %v295_v9 }
  0x10   :  { %522 = vmatpush3.bf16.msra.mxu0 %v521_v13 }
  0x11   :  { %523 = vmatprep.subr.bf16.mxu0 %v613_v3  ;;  %534 = vmatpush3.bf16.msra.mxu1 %v533_v51 }
  0x12   :  { %535 = vmatprep.subr.bf16.mxu1 %v613_v3 }
  0x13   :  { %463 = vmatmul.mubr.msk.f32.vlgmr.msra.gmra.mrb[0].mxu0 %vm47_vm1, %v31_v14 }
  0x14   :  { %473 = vmatprep.mubr.msk.f32.mxu0 %vm614_vm0, %v615_v6  ;;  %525 = vmatpush3.bf16.msra.mxu0 %v524_v24 }
  0x15   :  { %526 = vmatprep.subr.bf16.mxu0 %v613_v3  ;;  %537 = vmatpush3.bf16.msra.mxu1 %v536_v54 }
  0x16   :  { %538 = vmatprep.subr.bf16.mxu1 %v613_v3 }
  0x18   :  { %528 = vmatpush3.bf16.msra.mxu0 %v527_v26 }
  0x19   :  { %540 = vmatpush3.bf16.msra.mxu1 %v539_v57 }
  0x1a   :  { %541 = vmatprep.subr.bf16.mxu1 %v613_v3 }
  0x1d   :  { %543 = vmatpush3.bf16.msra.mxu1 %v542_v60 }
  0x1e   :  { %544 = vmatprep.subr.bf16.mxu1 %v613_v3 }
  0x21   :  { %546 = vmatpush3.bf16.msra.mxu1 %v545_v63 }
  0x22   :  { %547 = vmatprep.subr.bf16.mxu1 %v613_v3 }
  0x25   :  { %549 = vmatpush3.bf16.msra.mxu1 %v548_v2 }
  0x26   :  { %550 = vmatprep.subr.bf16.mxu1 %v613_v3 }
  0x29   :  { %552 = vmatpush3.bf16.msra.mxu1 %v551_v11 }
  0xe6   :  { %v117_v16 = vpop.f32.mrb[0].mxu0 }
  0xe7   :  { %v118_v17 = vadd.f32 %v407_v15, %v117_v16  ;;  %v464_v18 = vpop.f32.mrb[1].mxu0  ;;  %v616_v16 = vmov 1.0  }
  0xe9   :  { %v121_v19 = vmul.f32 %v118_v17, %v118_v17 }
  0xeb   :  { %v123_v20 = vsel %vm122_vm2, %v121_v19, 0.0 }
  0xec   :  { %124 = vadd.xlane.f32.xlu0 %v123_v20 }
 0x179   :  { %v726_v27 = vpop.xlane.xlu0 %124 }
 0x17a   :  { %561 = vrsqrt.f32 %v726_v27  ;;  %vm128_vm3 = vcmp.eq.f32.partialorder %v726_v27, inf  ;;  %v131_v30 = vand.u32 2147483648, %v726_v27  ;;  %vm130_vm4 = vcmp.eq.f32.partialorder %v726_v27, 0.0 }
 0x184   :  { %v562_v28 = vpop.eup %561 }
 0x185   :  { %v127_v29 = vmul.f32 %v562_v28, %v726_v27 }
 0x187   :  { %v129_v31 = vsel %vm128_vm3, %v726_v27, %v127_v29 }
 0x188   :  { %v734_v32 = vsel %vm130_vm4, %v131_v30, %v129_v31 }
 0x189   :  { %v133_v33 = vmax.f32 %v734_v32, 1e-12 }
 0x18b   :  { %563 = vrcp.f32 %v133_v33  ;;  %v258_v20 = vmul.f32 2.0, %v133_v33 }
 0x195   :  { %v564_v34 = vpop.eup %563 }
 0x196   :  { %v135_v35 = vmul.f32 %v564_v34, %v118_v17 }
 0x198   :  { %474 = vmatmul.mubr.msk.f32.vlgmr.msra.gmra.mrb[2].mxu0 %vm122_vm2, %v135_v35 }
 0x26b   :  { %v209_v37 = vpop.f32.mrb[2].mxu0 }
 0x26c   :  { %v220_v38 = vsub.f32 %v209_v37, %v743_v36  ;;  %v475_v39 = vpop.f32.mrb[3].mxu0 }
 0x26e   :  { %221 = vmax.xlane.f32.xlu0 %v220_v38 }
 0x2fb   :  { %v748_v42 = vpop.xlane.xlu0 %221 }
 0x2fc   :  { %vm225_vm5 = vcmp.eq.f32.partialorder %v220_v38, %v748_v42 }
 0x2fd   :  { %v226_v43 = vsel %vm225_vm5, %v746_v41, 128 }
 0x2fe   :  { %v228_v44 = vshra.s32 %v226_v43, 16  ;;  %v227_v4 = vand.u32 65535, %v226_v43 }
 0x300   :  { %v230_v45 = vcvt.s32.f32 %v228_v44  ;;  %v229_v7 = vcvt.s32.f32 %v227_v4 }
 0x302   :  { %231 = vmin.xlane.f32.xlu1 %v230_v45 }
 0x38f   :  { %v232_v5 = vpop.xlane.xlu1 %231 }
 0x390   :  { %vm233_vm6 = vcmp.eq.f32.partialorder %v230_v45, %v232_v5  ;;  %v238_v12 = vcvt.f32.s32 %v232_v5 }
 0x391   :  { %v234_v8 = vsel %vm233_vm6, %v229_v7, inf }
 0x392   :  { %235 = vmin.xlane.f32.xlu1 %v234_v8  ;;  %v239_v14 = vshll.u32 %v238_v12, 16 }
 0x41f   :  { %v236_v13 = vpop.xlane.xlu1 %235 }
 0x420   :  { %v237_v3 = vcvt.f32.s32 %v236_v13 }
 0x422   :  { %v240_v15 = vadd.s32 %v239_v14, %v237_v3 }
 0x424   :  { %vm243_vm8 = vcmp.eq.s32.totalorder %v746_v41, %v240_v15  ;;  %242 = vst.msk [vmem:[%s855_s8] sm:$0xff] %vm241_vm7, %v240_v15 }
 0x425   :  { %509 = vmatmul.mubr.msk.f32.vlgmr.msra.gmra.mrb[0].mxu1 %vm243_vm8, %v616_v16  ;;  %v411_v17 = vsel %vm243_vm8, 1.0, %v615_v6  ;;  %v413_v6 = vld [vmem:[%s853_s6] ss:$0 sm:$0xff] }
 0x426   :  { %v253_v18 = vmul.f32 %v411_v17, %v743_v36 }
 0x428   :  { %254 = vadd.xlane.f32.xlu0 %v253_v18 }
 0x4b5   :  { %v255_v19 = vpop.xlane.xlu0 %254 }
 0x4b6   :  { %v256_v21 = vadd.f32 %v255_v19, %v748_v42  ;;  %v257_v22 = vmul.f32 2.0, %v255_v19 }
 0x4b8   :  { %v259_v23 = vmul.f32 %v258_v20, %v256_v21 }
 0x4ba   :  { %v260_v24 = vsub.f32 %v257_v22, %v259_v23 }
 0x4bc   :  { %v261_v25 = vadd.f32 %v260_v24, %v726_v27 }
 0x4be   :  { %v269_v26 = vsel %vm241_vm7, %v261_v25, 0.0 }
 0x4bf   :  { %270 = vadd.xlane.f32.xlu1 %v269_v26 }
 0x4f8   :  { %v370_v28 = vpop.f32.mrb[0].mxu1 }
 0x4f9   :  { %v371_v29 = vadd.f32 %v413_v6, %v370_v28  ;;  %v510_v30 = vpop.f32.mrb[1].mxu1 }
 0x4fb   :  { %374 = vst.msk [vmem:[#allocation2] sm:$0xff] %vm47_vm1, %v371_v29 }
 0x4fc   :  { %576 = shalt.err (!%p573_p4)
}
 0x4fd   :  { %s577_s26 = scalar_lea.hbm %s854_s7, 128 }
 0x4fe   :  { %p578_p5 = scmp.ne.s32.totalorder %s854_s7, %s577_s26  ;;  %p581_p6 = scmp.lt.u32.totalorder %s577_s26, %s854_s7 }
 0x500   :  { %p583_p7 = pnand %p581_p6, %p578_p5 }
 0x502   :  { %586 = shalt.err (!%p583_p7)
}
 0x503   :  { %384 = dma.vmem_to_hbm [thread:$0]  %s382_s22, 128, %s854_s7, [#allocation3]  }
 0x504   :  { %s618_s30 = smov [#allocation4]  }
 0x505   :  { %s393_s10 = sshll.u32 %s618_s30, 4  ;;  %s394_s10 = int_to_ptr.vmem [resolvable:$true] %s393_s10 }
 0x506   :  { %s587_s2 = scalar_lea.vmem %s394_s10, 16  ;;  %s591_s12 = scalar_lea.vmem %s394_s10, 32 }
 0x507   :  { %p588_p8 = scmp.ne.s32.totalorder %s394_s10, %s587_s2  ;;  %p592_p9 = scmp.lt.s32.totalorder %s394_s10, %s394_s10 }
 0x508   :  { %p593_p10 = scmp.lt.s32.totalorder %s591_s12, %s587_s2 }
 0x50a   :  { %p594_p11 = por %p593_p10, %p592_p9 }
 0x50c   :  { %p595_p12 = pnand %p594_p11, %p588_p8 }
 0x54c   :  { %v271_v27 = vpop.xlane.xlu1 %270 }
 0x54d   :  { %v272_v31 = vrot.slane %v271_v27, 4 }
 0x54f   :  { %v273_v32 = vadd.f32 %v272_v31, %v271_v27 }
 0x551   :  { %v274_v33 = vrot.slane %v273_v32, 2 }
 0x553   :  { %v275_v34 = vadd.f32 %v274_v33, %v273_v32 }
 0x555   :  { %v276_v35 = vrot.slane %v275_v34, 1 }
 0x557   :  { %v277_v36 = vadd.f32 %v276_v35, %v275_v34 }
 0x559   :  { %553 = vpush %v277_v36 }
 0x58a   :  { %s554_s11 = spop %553 }
 0x58b   :  { %v279_v37 = vstv %s554_s11 }
 0x58c   :  { %280 = vst [vmem:[#allocation4] sm:$0x1] %v279_v37 }
 0x58d   :  { %598 = shalt.err (!%p595_p12)
}
 0x58e   :  { %s599_s13 = scalar_lea.hbm %s856_s9, 16 }
 0x58f   :  { %p600_p13 = scmp.ne.s32.totalorder %s856_s9, %s599_s13  ;;  %p603_p0 = scmp.lt.u32.totalorder %s599_s13, %s856_s9 }
 0x591   :  { %p605_p1 = pnand %p603_p0, %p600_p13 }
 0x593   :  { %608 = shalt.err (!%p605_p1)
}
 0x594   :  { %396 = dma.vmem_to_hbm [thread:$0]  %s394_s10, 16, %s856_s9, [#allocation5]  }
 0x595   :  { %609 = dma.done.wait [#allocation3], 128  }
 0x596   :  { %610 = vsyncadd [#allocation3], 4294967168 }
 0x597   :  { %611 = dma.done.wait [#allocation5], 16  }
 0x598   :  { %612 = vsyncadd [#allocation5], 4294967280 }
 0x599   :  { %405 = vsyncpa [#allocation3], 1 }
 0x59a   :  { %406 = vsyncpa [#allocation5], 1 }

</bundles_post_ra>
